<compile_context>
chip_gen: v5e
topology: v5e:2x2
jax: 0.10.0
libtpu: 0.0.40
codegen_flags: <defaults>
</compile_context>

<pallas_src>
import jax
import jax.numpy as jnp
from jax.experimental import pallas as pl
from jax.experimental.pallas import tpu as pltpu

_EPS = 1e-15     # torch_geometric dense_diff_pool EPS
_BN_EPS = 1e-5   # torch.nn.BatchNorm1d default eps


def _diffpool_kernel(x_ref, adj_ref, mask_ref,
                     wrel_p_ref, wroot_p_ref, b_p_ref,
                     wrel_e_ref, wroot_e_ref, b_e_ref,
                     scale_p_ref, shift_p_ref,
                     scale_e_ref, shift_e_ref,
                     scale_f_ref, shift_f_ref,
                     embed_ref, adjp_ref, assign_ref, link_ref, ent_ref):
    TB, N, D = x_ref.shape
    C = wrel_p_ref.shape[1]
    R = TB * N

    x3 = x_ref[...]                                    # (TB, N, D)
    adj3 = adj_ref[...]                                # (TB, N, N)
    x2 = x3.reshape(R, D)
    mask2 = mask_ref[...].reshape(R, 1)

    # DenseGraphConv neighborhood aggregation: A = adj @ x (batched, MXU).
    agg3 = jnp.einsum('bij,bjd->bid', adj3, x3,
                      preferred_element_type=jnp.float32)       # (TB, N, D)
    agg2 = agg3.reshape(R, D)

    # GNN projections on the flattened (TB*N, D) row block (tall MXU operands).
    s_conv = (jnp.dot(agg2, wrel_p_ref[...], preferred_element_type=jnp.float32)
              + jnp.dot(x2, wroot_p_ref[...], preferred_element_type=jnp.float32)
              + b_p_ref[...]) * mask2                           # (R, C)
    h_conv = (jnp.dot(agg2, wrel_e_ref[...], preferred_element_type=jnp.float32)
              + jnp.dot(x2, wroot_e_ref[...], preferred_element_type=jnp.float32)
              + b_e_ref[...]) * mask2                           # (R, D)

    # BatchNorm (eval, folded scale/shift) + ReLU; embed GNN has the residual.
    s_act = jnp.maximum(s_conv * scale_p_ref[...] + shift_p_ref[...], 0.0)
    h_act = jnp.maximum((x2 + h_conv) * scale_e_ref[...] + shift_e_ref[...], 0.0)
    # TODO(synk): dropout(h_act) is an identity here (inference mode).

    # Cluster assignment = row softmax of s (returned unmasked).
    m_row = jnp.max(s_act, axis=-1, keepdims=True)
    e_row = jnp.exp(s_act - m_row)
    s_soft = e_row / jnp.sum(e_row, axis=-1, keepdims=True)     # (R, C)
    assign_ref[...] = s_soft.reshape(TB, N, C)

    # dense_diff_pool: mask the embeddings and the assignment.
    s_m2 = s_soft * mask2                                       # (R, C)
    x_m2 = h_act * mask2                                        # (R, D)

    # Entropy partial sum (masked rows contribute exactly 0).
    ent_sum = jnp.sum(-s_m2 * jnp.log(s_m2 + _EPS))

    # NT contraction (contract last dims of both operands): no K.T-style copy.
    contract_cols = (((1,), (1,)), ((), ()))

    link_sq = 0.0
    for b in range(TB):                         # static unroll over the tile
        s_m = s_m2[b * N:(b + 1) * N, :]        # (N, C)
        x_m = x_m2[b * N:(b + 1) * N, :]        # (N, D)
        adj_b = adj3[b]                         # (N, N)

        s_mT = s_m.T                            # one tiny transpose, reused twice
        pooled = jnp.dot(s_mT, x_m, preferred_element_type=jnp.float32)      # (C, D)
        sta = jnp.dot(s_mT, adj_b, preferred_element_type=jnp.float32)       # (C, N)
        adj_pool_b = jnp.dot(sta, s_m, preferred_element_type=jnp.float32)   # (C, C)

        sst = jax.lax.dot_general(s_m, s_m, contract_cols,
                                  preferred_element_type=jnp.float32)        # (N, N)
        diff = adj_b - sst
        link_sq = link_sq + jnp.sum(diff * diff)

        # Final BatchNorm (eval, folded) + ReLU on the pooled embeddings.
        embed_ref[b] = jnp.maximum(pooled * scale_f_ref[...] + shift_f_ref[...], 0.0)
        adjp_ref[b] = adj_pool_b

    # Per-tile scalar partials (lane-broadcast), finalized in the wrapper.
    link_ref[...] = jnp.broadcast_to(link_sq, (1, 1, 128)).astype(jnp.float32)
    ent_ref[...] = jnp.broadcast_to(ent_sum, (1, 1, 128)).astype(jnp.float32)


def _fold_bn(gamma, beta, mean, var, eps=_BN_EPS):
    scale = gamma / jnp.sqrt(var + eps)
    shift = beta - mean * scale
    return scale, shift


def diffpool_forward(node_emds, adj_matrices, pad_masks, params, *, batch_tile=None):
    """Pallas implementation of DiffPool.forward (inference mode).

    Args:
      node_emds:    (B, N, D) float32 node embeddings.
      adj_matrices: (B, N, N) float32 dense adjacency matrices.
      pad_masks:    (B, N) bool/float node-validity mask.
      params: dict of weights (nn.Linear weights stored as (out, in)).
    Returns:
      (embed_pool, adj_pool, cluster_assign, link_loss, ent_loss)
    """
    B, N, D = node_emds.shape
    C = params["pool_rel_w"].shape[0]

    # Batch tile: fill MXU rows (TB*N) but keep >= 2 grid steps so the
    # "parallel" batch axis can shard across v7x's two TensorCores.
    if batch_tile is None:
        batch_tile = max(1, min(B, 256 // max(N, 1)))
        if B >= 2:
            batch_tile = min(batch_tile, max(1, B // 2))
        while B % batch_tile:
            batch_tile -= 1
    TB = batch_tile
    assert B % TB == 0
    G = B // TB

    mask_f = pad_masks.astype(jnp.float32).reshape(B, N, 1)

    # nn.Linear stores (out, in); pre-transpose once so the kernel does x @ W.
    wrel_p = params["pool_rel_w"].T
    wroot_p = params["pool_root_w"].T
    b_p = params["pool_rel_b"].reshape(1, C)
    wrel_e = params["emb_rel_w"].T
    wroot_e = params["emb_root_w"].T
    b_e = params["emb_rel_b"].reshape(1, D)

    scale_p, shift_p = _fold_bn(params["pool_bn_gamma"], params["pool_bn_beta"],
                                params["pool_bn_mean"], params["pool_bn_var"])
    scale_e, shift_e = _fold_bn(params["emb_bn_gamma"], params["emb_bn_beta"],
                                params["emb_bn_mean"], params["emb_bn_var"])
    scale_f, shift_f = _fold_bn(params["final_bn_gamma"], params["final_bn_beta"],
                                params["final_bn_mean"], params["final_bn_var"])
    scale_p, shift_p = scale_p.reshape(1, C), shift_p.reshape(1, C)
    scale_e, shift_e = scale_e.reshape(1, D), shift_e.reshape(1, D)
    scale_f, shift_f = scale_f.reshape(1, D), shift_f.reshape(1, D)

    def tile(shape):
        zeros = (0,) * (len(shape) - 1)
        return pl.BlockSpec(shape, lambda g: (g,) + zeros)

    def full(shape):
        zeros = (0,) * len(shape)
        return pl.BlockSpec(shape, lambda g: zeros)

    out_shapes = (
        jax.ShapeDtypeStruct((B, C, D), jnp.float32),    # embed_pool
        jax.ShapeDtypeStruct((B, C, C), jnp.float32),    # adj_pool
        jax.ShapeDtypeStruct((B, N, C), jnp.float32),    # cluster_assign
        jax.ShapeDtypeStruct((G, 1, 128), jnp.float32),  # link-loss partial sums
        jax.ShapeDtypeStruct((G, 1, 128), jnp.float32),  # entropy partial sums
    )

    embed_pool, adj_pool, cluster_assign, link_part, ent_part = pl.pallas_call(
        _diffpool_kernel,
        out_shape=out_shapes,
        grid_spec=pltpu.PrefetchScalarGridSpec(
            num_scalar_prefetch=0,
            grid=(G,),
            in_specs=[
                tile((TB, N, D)),                          # node embeddings
                tile((TB, N, N)),                          # adjacency
                tile((TB, N, 1)),                          # pad mask
                full((D, C)), full((D, C)), full((1, C)),  # pool conv (rel, root, bias)
                full((D, D)), full((D, D)), full((1, D)),  # embed conv (rel, root, bias)
                full((1, C)), full((1, C)),                # pool BN (scale, shift)
                full((1, D)), full((1, D)),                # embed BN
                full((1, D)), full((1, D)),                # final BN
            ],
            out_specs=[
                tile((TB, C, D)),
                tile((TB, C, C)),
                tile((TB, N, C)),
                tile((1, 1, 128)),
                tile((1, 1, 128)),
            ],
        ),
        compiler_params=pltpu.CompilerParams(
            dimension_semantics=("parallel",),
            vmem_limit_bytes=32 * 1024 * 1024,
        ),
    )(node_emds, adj_matrices, mask_f,
      wrel_p, wroot_p, b_p, wrel_e, wroot_e, b_e,
      scale_p, shift_p, scale_e, shift_e, scale_f, shift_f)

    # Finalize the cross-batch scalar reductions from the per-tile partials.
    link_loss = jnp.sqrt(jnp.sum(link_part[:, 0, 0])) / float(B * N * N)
    ent_loss = jnp.sum(ent_part[:, 0, 0]) / float(B * N)
    return embed_pool, adj_pool, cluster_assign, link_loss, ent_loss


def _reference(node_emds, adj, pad_masks, params):
    """Pure-JAX reference mirroring the PyTorch eval-mode forward."""
    mask = pad_masks.astype(node_emds.dtype)[..., None]          # (B, N, 1)

    def dense_graph_conv(x, w_rel, b_rel, w_root):
        out = jnp.einsum('bij,bjd->bid', adj, x) @ w_rel.T + b_rel
        out = out + x @ w_root.T
        return out * mask

    def bn_eval(x, gamma, beta, mean, var):
        return (x - mean) / jnp.sqrt(var + _BN_EPS) * gamma + beta

    # gnn_pool (no residual)
    s = dense_graph_conv(node_emds, params["pool_rel_w"], params["pool_rel_b"],
                         params["pool_root_w"])
    s = jax.nn.relu(bn_eval(s, params["pool_bn_gamma"], params["pool_bn_beta"],
                            params["pool_bn_mean"], params["pool_bn_var"]))
    # gnn_embed (residual)
    h = node_emds + dense_graph_conv(node_emds, params["emb_rel_w"],
                                     params["emb_rel_b"], params["emb_root_w"])
    h = jax.nn.relu(bn_eval(h, params["emb_bn_gamma"], params["emb_bn_beta"],
                            params["emb_bn_mean"], params["emb_bn_var"]))

    # dense_diff_pool
    s_soft = jax.nn.softmax(s, axis=-1)
    s_m = s_soft * mask
    x_m = h * mask
    out = jnp.einsum('bnc,bnd->bcd', s_m, x_m)
    out_adj = jnp.einsum('bnc,bnm,bmk->bck', s_m, adj, s_m)
    link = adj - jnp.einsum('bnc,bmc->bnm', s_m, s_m)
    link_loss = jnp.sqrt(jnp.sum(link ** 2)) / adj.size
    ent_loss = jnp.mean(jnp.sum(-s_m * jnp.log(s_m + _EPS), axis=-1))

    out = jax.nn.relu(bn_eval(out, params["final_bn_gamma"], params["final_bn_beta"],
                              params["final_bn_mean"], params["final_bn_var"]))
    return out, out_adj, s_soft, link_loss, ent_loss


if __name__ == "__main__":
    B, N, D, C = 2, 16, 32, 8   # batch, nodes, d_model, num_clusters

    root = jax.random.PRNGKey(0)
    keys = jax.random.split(root, 24)
    bound = 1.0 / (D ** 0.5)

    params = {
        "pool_rel_w": jax.random.uniform(keys[0], (C, D), jnp.float32, -bound, bound),
        "pool_rel_b": jax.random.uniform(keys[1], (C,), jnp.float32, -bound, bound),
        "pool_root_w": jax.random.uniform(keys[2], (C, D), jnp.float32, -bound, bound),
        "emb_rel_w": jax.random.uniform(keys[3], (D, D), jnp.float32, -bound, bound),
        "emb_rel_b": jax.random.uniform(keys[4], (D,), jnp.float32, -bound, bound),
        "emb_root_w": jax.random.uniform(keys[5], (D, D), jnp.float32, -bound, bound),
        "pool_bn_gamma": jax.random.uniform(keys[6], (C,), jnp.float32, 0.5, 1.5),
        "pool_bn_beta": 0.1 * jax.random.normal(keys[7], (C,), jnp.float32),
        "pool_bn_mean": 0.1 * jax.random.normal(keys[8], (C,), jnp.float32),
        "pool_bn_var": jax.random.uniform(keys[9], (C,), jnp.float32, 0.5, 1.5),
        "emb_bn_gamma": jax.random.uniform(keys[10], (D,), jnp.float32, 0.5, 1.5),
        "emb_bn_beta": 0.1 * jax.random.normal(keys[11], (D,), jnp.float32),
        "emb_bn_mean": 0.1 * jax.random.normal(keys[12], (D,), jnp.float32),
        "emb_bn_var": jax.random.uniform(keys[13], (D,), jnp.float32, 0.5, 1.5),
        "final_bn_gamma": jax.random.uniform(keys[14], (D,), jnp.float32, 0.5, 1.5),
        "final_bn_beta": 0.1 * jax.random.normal(keys[15], (D,), jnp.float32),
        "final_bn_mean": 0.1 * jax.random.normal(keys[16], (D,), jnp.float32),
        "final_bn_var": jax.random.uniform(keys[17], (D,), jnp.float32, 0.5, 1.5),
    }

    node_emds = jax.random.normal(keys[18], (B, N, D), jnp.float32)

    lengths = jnp.array([N, N - 4], dtype=jnp.int32)                 # padded graph 1
    pad_masks = jnp.arange(N)[None, :] < lengths[:, None]            # (B, N) bool
    mf = pad_masks.astype(jnp.float32)

    adj = (jax.random.uniform(keys[19], (B, N, N)) < 0.3).astype(jnp.float32)
    adj = jnp.maximum(adj, jnp.transpose(adj, (0, 2, 1)))            # symmetric 0/1
    adj = adj * mf[:, :, None] * mf[:, None, :]                      # no edges to padding

    outs = diffpool_forward(node_emds, adj, pad_masks, params)
    jax.block_until_ready(outs)
    embed_pool, adj_pool, cluster_assign, link_loss, ent_loss = outs

    r_embed, r_adj, r_assign, r_link, r_ent = _reference(node_emds, adj, pad_masks, params)

    assert embed_pool.shape == (B, C, D) and adj_pool.shape == (B, C, C)
    assert cluster_assign.shape == (B, N, C)
    assert jnp.allclose(embed_pool, r_embed, atol=1e-4, rtol=1e-4)
    assert jnp.allclose(adj_pool, r_adj, atol=1e-4, rtol=1e-4)
    assert jnp.allclose(cluster_assign, r_assign, atol=1e-4, rtol=1e-4)
    assert jnp.allclose(link_loss, r_link, atol=1e-4, rtol=1e-4)
    assert jnp.allclose(ent_loss, r_ent, atol=1e-4, rtol=1e-4)

    print("KERNEL_OK")
</pallas_src>

<mosaic_0001>
module attributes {stable_mosaic.version = 11 : i64} {
  func.func @_diffpool_kernel(%arg0: i32, %arg1: memref<1x16x32xf32, #tpu.memory_space<vmem>>, %arg2: memref<1x16x16xf32, #tpu.memory_space<vmem>>, %arg3: memref<1x16x1xf32, #tpu.memory_space<vmem>>, %arg4: memref<32x8xf32, #tpu.memory_space<vmem>>, %arg5: memref<32x8xf32, #tpu.memory_space<vmem>>, %arg6: memref<1x8xf32, #tpu.memory_space<vmem>>, %arg7: memref<32x32xf32, #tpu.memory_space<vmem>>, %arg8: memref<32x32xf32, #tpu.memory_space<vmem>>, %arg9: memref<1x32xf32, #tpu.memory_space<vmem>>, %arg10: memref<1x8xf32, #tpu.memory_space<vmem>>, %arg11: memref<1x8xf32, #tpu.memory_space<vmem>>, %arg12: memref<1x32xf32, #tpu.memory_space<vmem>>, %arg13: memref<1x32xf32, #tpu.memory_space<vmem>>, %arg14: memref<1x32xf32, #tpu.memory_space<vmem>>, %arg15: memref<1x32xf32, #tpu.memory_space<vmem>>, %arg16: memref<1x8x32xf32, #tpu.memory_space<vmem>>, %arg17: memref<1x8x8xf32, #tpu.memory_space<vmem>>, %arg18: memref<1x16x8xf32, #tpu.memory_space<vmem>>, %arg19: memref<1x1x128xf32, #tpu.memory_space<vmem>>, %arg20: memref<1x1x128xf32, #tpu.memory_space<vmem>>) attributes {dimension_semantics = [#tpu.dimension_semantics<parallel>], iteration_bounds = array<i64: 2>, scalar_prefetch = 0 : i64, scratch_operands = 0 : i64, tpu.core_type = #tpu.core_type<tc>, window_params = [{transform_indices = @transform_0, window_bounds = array<i64: 1, 16, 32>}, {transform_indices = @transform_1, window_bounds = array<i64: 1, 16, 16>}, {transform_indices = @transform_2, window_bounds = array<i64: 1, 16, 1>}, {pipeline_mode = #tpu.pipeline_mode<synchronous>, transform_indices = @transform_3, window_bounds = array<i64: 32, 8>}, {pipeline_mode = #tpu.pipeline_mode<synchronous>, transform_indices = @transform_4, window_bounds = array<i64: 32, 8>}, {pipeline_mode = #tpu.pipeline_mode<synchronous>, transform_indices = @transform_5, window_bounds = array<i64: 1, 8>}, {pipeline_mode = #tpu.pipeline_mode<synchronous>, transform_indices = @transform_6, window_bounds = array<i64: 32, 32>}, {pipeline_mode = #tpu.pipeline_mode<synchronous>, transform_indices = @transform_7, window_bounds = array<i64: 32, 32>}, {pipeline_mode = #tpu.pipeline_mode<synchronous>, transform_indices = @transform_8, window_bounds = array<i64: 1, 32>}, {pipeline_mode = #tpu.pipeline_mode<synchronous>, transform_indices = @transform_9, window_bounds = array<i64: 1, 8>}, {pipeline_mode = #tpu.pipeline_mode<synchronous>, transform_indices = @transform_10, window_bounds = array<i64: 1, 8>}, {pipeline_mode = #tpu.pipeline_mode<synchronous>, transform_indices = @transform_11, window_bounds = array<i64: 1, 32>}, {pipeline_mode = #tpu.pipeline_mode<synchronous>, transform_indices = @transform_12, window_bounds = array<i64: 1, 32>}, {pipeline_mode = #tpu.pipeline_mode<synchronous>, transform_indices = @transform_13, window_bounds = array<i64: 1, 32>}, {pipeline_mode = #tpu.pipeline_mode<synchronous>, transform_indices = @transform_14, window_bounds = array<i64: 1, 32>}, {transform_indices = @transform_15, window_bounds = array<i64: 1, 8, 32>}, {transform_indices = @transform_16, window_bounds = array<i64: 1, 8, 8>}, {transform_indices = @transform_17, window_bounds = array<i64: 1, 16, 8>}, {transform_indices = @transform_18, window_bounds = array<i64: 1, 1, 128>}, {transform_indices = @transform_19, window_bounds = array<i64: 1, 1, 128>}]} {
    %c0 = arith.constant 0 : index
    %c0_0 = arith.constant 0 : index
    %c0_1 = arith.constant 0 : index
    %0 = vector.load %arg1[%c0, %c0_0, %c0_1] : memref<1x16x32xf32, #tpu.memory_space<vmem>>, vector<1x16x32xf32>
    %c0_2 = arith.constant 0 : index
    %c0_3 = arith.constant 0 : index
    %c0_4 = arith.constant 0 : index
    %1 = vector.load %arg2[%c0_2, %c0_3, %c0_4] : memref<1x16x16xf32, #tpu.memory_space<vmem>>, vector<1x16x16xf32>
    %2 = vector.shape_cast %0 : vector<1x16x32xf32> to vector<16x32xf32>
    %c0_5 = arith.constant 0 : index
    %c0_6 = arith.constant 0 : index
    %c0_7 = arith.constant 0 : index
    %3 = vector.load %arg3[%c0_5, %c0_6, %c0_7] : memref<1x16x1xf32, #tpu.memory_space<vmem>>, vector<1x16x1xf32>
    %4 = vector.shape_cast %3 : vector<1x16x1xf32> to vector<16x1xf32>
    "tpu.trace_start"() <{level = 10 : i32, message = "bij,bjd->bid"}> : () -> ()
    %cst = arith.constant dense<0.000000e+00> : vector<1x16x32xf32>
    %5 = tpu.matmul %1, %0, %cst {dimension_numbers = #tpu.dot_dimension_numbers<[2], [1], [1], [2], [0, 0, 0, 1, 1, 2], [0], [0]>} : vector<1x16x16xf32>, vector<1x16x32xf32>, vector<1x16x32xf32> -> vector<1x16x32xf32>
    "tpu.trace_stop"() : () -> ()
    %6 = vector.shape_cast %5 : vector<1x16x32xf32> to vector<16x32xf32>
    %c0_8 = arith.constant 0 : index
    %c0_9 = arith.constant 0 : index
    %7 = vector.load %arg4[%c0_8, %c0_9] : memref<32x8xf32, #tpu.memory_space<vmem>>, vector<32x8xf32>
    %cst_10 = arith.constant dense<0.000000e+00> : vector<16x8xf32>
    %8 = tpu.matmul %6, %7, %cst_10 {dimension_numbers = #tpu.dot_dimension_numbers<[1], [0], [0], [1], [0, 0, 1, 1], [], []>} : vector<16x32xf32>, vector<32x8xf32>, vector<16x8xf32> -> vector<16x8xf32>
    %c0_11 = arith.constant 0 : index
    %c0_12 = arith.constant 0 : index
    %9 = vector.load %arg5[%c0_11, %c0_12] : memref<32x8xf32, #tpu.memory_space<vmem>>, vector<32x8xf32>
    %cst_13 = arith.constant dense<0.000000e+00> : vector<16x8xf32>
    %10 = tpu.matmul %2, %9, %cst_13 {dimension_numbers = #tpu.dot_dimension_numbers<[1], [0], [0], [1], [0, 0, 1, 1], [], []>} : vector<16x32xf32>, vector<32x8xf32>, vector<16x8xf32> -> vector<16x8xf32>
    %11 = arith.addf %8, %10 : vector<16x8xf32>
    %c0_14 = arith.constant 0 : index
    %c0_15 = arith.constant 0 : index
    %12 = vector.load %arg6[%c0_14, %c0_15] : memref<1x8xf32, #tpu.memory_space<vmem>>, vector<1x8xf32>
    %13 = vector.broadcast %12 : vector<1x8xf32> to vector<16x8xf32>
    %14 = arith.addf %11, %13 : vector<16x8xf32>
    %15 = vector.broadcast %4 : vector<16x1xf32> to vector<16x8xf32>
    %16 = arith.mulf %14, %15 : vector<16x8xf32>
    %c0_16 = arith.constant 0 : index
    %c0_17 = arith.constant 0 : index
    %17 = vector.load %arg7[%c0_16, %c0_17] : memref<32x32xf32, #tpu.memory_space<vmem>>, vector<32x32xf32>
    %cst_18 = arith.constant dense<0.000000e+00> : vector<16x32xf32>
    %18 = tpu.matmul %6, %17, %cst_18 {dimension_numbers = #tpu.dot_dimension_numbers<[1], [0], [0], [1], [0, 0, 1, 1], [], []>} : vector<16x32xf32>, vector<32x32xf32>, vector<16x32xf32> -> vector<16x32xf32>
    %c0_19 = arith.constant 0 : index
    %c0_20 = arith.constant 0 : index
    %19 = vector.load %arg8[%c0_19, %c0_20] : memref<32x32xf32, #tpu.memory_space<vmem>>, vector<32x32xf32>
    %cst_21 = arith.constant dense<0.000000e+00> : vector<16x32xf32>
    %20 = tpu.matmul %2, %19, %cst_21 {dimension_numbers = #tpu.dot_dimension_numbers<[1], [0], [0], [1], [0, 0, 1, 1], [], []>} : vector<16x32xf32>, vector<32x32xf32>, vector<16x32xf32> -> vector<16x32xf32>
    %21 = arith.addf %18, %20 : vector<16x32xf32>
    %c0_22 = arith.constant 0 : index
    %c0_23 = arith.constant 0 : index
    %22 = vector.load %arg9[%c0_22, %c0_23] : memref<1x32xf32, #tpu.memory_space<vmem>>, vector<1x32xf32>
    %23 = vector.broadcast %22 : vector<1x32xf32> to vector<16x32xf32>
    %24 = arith.addf %21, %23 : vector<16x32xf32>
    %25 = vector.broadcast %4 : vector<16x1xf32> to vector<16x32xf32>
    %26 = arith.mulf %24, %25 : vector<16x32xf32>
    %c0_24 = arith.constant 0 : index
    %c0_25 = arith.constant 0 : index
    %27 = vector.load %arg10[%c0_24, %c0_25] : memref<1x8xf32, #tpu.memory_space<vmem>>, vector<1x8xf32>
    %28 = vector.broadcast %27 : vector<1x8xf32> to vector<16x8xf32>
    %29 = arith.mulf %16, %28 : vector<16x8xf32>
    %c0_26 = arith.constant 0 : index
    %c0_27 = arith.constant 0 : index
    %30 = vector.load %arg11[%c0_26, %c0_27] : memref<1x8xf32, #tpu.memory_space<vmem>>, vector<1x8xf32>
    %31 = vector.broadcast %30 : vector<1x8xf32> to vector<16x8xf32>
    %32 = arith.addf %29, %31 : vector<16x8xf32>
    %cst_28 = arith.constant 0.000000e+00 : f32
    %33 = vector.broadcast %cst_28 : f32 to vector<16x8xf32>
    %34 = arith.maximumf %32, %33 : vector<16x8xf32>
    %35 = arith.addf %2, %26 : vector<16x32xf32>
    %c0_29 = arith.constant 0 : index
    %c0_30 = arith.constant 0 : index
    %36 = vector.load %arg12[%c0_29, %c0_30] : memref<1x32xf32, #tpu.memory_space<vmem>>, vector<1x32xf32>
    %37 = vector.broadcast %36 : vector<1x32xf32> to vector<16x32xf32>
    %38 = arith.mulf %35, %37 : vector<16x32xf32>
    %c0_31 = arith.constant 0 : index
    %c0_32 = arith.constant 0 : index
    %39 = vector.load %arg13[%c0_31, %c0_32] : memref<1x32xf32, #tpu.memory_space<vmem>>, vector<1x32xf32>
    %40 = vector.broadcast %39 : vector<1x32xf32> to vector<16x32xf32>
    %41 = arith.addf %38, %40 : vector<16x32xf32>
    %cst_33 = arith.constant 0.000000e+00 : f32
    %42 = vector.broadcast %cst_33 : f32 to vector<16x32xf32>
    %43 = arith.maximumf %41, %42 : vector<16x32xf32>
    %cst_34 = arith.constant dense<0xFF800000> : vector<16xf32>
    %44 = vector.multi_reduction <maximumf>, %34, %cst_34 [1] : vector<16x8xf32> to vector<16xf32>
    %45 = vector.shape_cast %44 : vector<16xf32> to vector<16x1xf32>
    %46 = vector.broadcast %45 : vector<16x1xf32> to vector<16x8xf32>
    %47 = arith.subf %34, %46 : vector<16x8xf32>
    %48 = math.exp %47 : vector<16x8xf32>
    %cst_35 = arith.constant dense<0.000000e+00> : vector<16xf32>
    %49 = vector.multi_reduction <add>, %48, %cst_35 [1] : vector<16x8xf32> to vector<16xf32>
    %50 = vector.shape_cast %49 : vector<16xf32> to vector<16x1xf32>
    %51 = vector.broadcast %50 : vector<16x1xf32> to vector<16x8xf32>
    %52 = arith.divf %48, %51 : vector<16x8xf32>
    %53 = vector.shape_cast %52 : vector<16x8xf32> to vector<1x16x8xf32>
    %c0_36 = arith.constant 0 : index
    %c0_37 = arith.constant 0 : index
    %c0_38 = arith.constant 0 : index
    %54 = vector.load %arg18[%c0_36, %c0_37, %c0_38] : memref<1x16x8xf32, #tpu.memory_space<vmem>>, vector<1x16x8xf32>
    tpu.vector_store %arg18[%c0_36, %c0_37, %c0_38], %53 {strides = array<i32>} : memref<1x16x8xf32, #tpu.memory_space<vmem>>, vector<1x16x8xf32>,
    %55 = vector.broadcast %4 : vector<16x1xf32> to vector<16x8xf32>
    %56 = arith.mulf %52, %55 : vector<16x8xf32>
    %57 = vector.broadcast %4 : vector<16x1xf32> to vector<16x32xf32>
    %58 = arith.mulf %43, %57 : vector<16x32xf32>
    %cst_39 = arith.constant 0.000000e+00 : f32
    %59 = vector.broadcast %cst_39 : f32 to vector<16x8xf32>
    %60 = arith.subf %59, %56 : vector<16x8xf32>
    %cst_40 = arith.constant 1.000000e-15 : f32
    %61 = vector.broadcast %cst_40 : f32 to vector<16x8xf32>
    %62 = arith.addf %56, %61 : vector<16x8xf32>
    %63 = math.log %62 : vector<16x8xf32>
    %64 = arith.mulf %60, %63 : vector<16x8xf32>
    %65 = vector.shape_cast %64 : vector<16x8xf32> to vector<1x16x8xf32>
    %cst_41 = arith.constant dense<0.000000e+00> : vector<1xf32>
    %66 = vector.multi_reduction <add>, %65, %cst_41 [1, 2] : vector<1x16x8xf32> to vector<1xf32>
    %67 = vector.shape_cast %66 : vector<1xf32> to vector<1x1x1xf32>
    %68 = vector.extract %67[0, 0, 0] : f32 from vector<1x1x1xf32>
    %69 = vector.shape_cast %1 : vector<1x16x16xf32> to vector<16x16xf32>
    %70 = tpu.transpose %56, [1, 0] : vector<16x8xf32> -> vector<8x16xf32>
    %cst_42 = arith.constant dense<0.000000e+00> : vector<8x32xf32>
    %71 = tpu.matmul %70, %58, %cst_42 {dimension_numbers = #tpu.dot_dimension_numbers<[1], [0], [0], [1], [0, 0, 1, 1], [], []>} : vector<8x16xf32>, vector<16x32xf32>, vector<8x32xf32> -> vector<8x32xf32>
    %cst_43 = arith.constant dense<0.000000e+00> : vector<8x16xf32>
    %72 = tpu.matmul %70, %69, %cst_43 {dimension_numbers = #tpu.dot_dimension_numbers<[1], [0], [0], [1], [0, 0, 1, 1], [], []>} : vector<8x16xf32>, vector<16x16xf32>, vector<8x16xf32> -> vector<8x16xf32>
    %cst_44 = arith.constant dense<0.000000e+00> : vector<8x8xf32>
    %73 = tpu.matmul %72, %56, %cst_44 {dimension_numbers = #tpu.dot_dimension_numbers<[1], [0], [0], [1], [0, 0, 1, 1], [], []>} : vector<8x16xf32>, vector<16x8xf32>, vector<8x8xf32> -> vector<8x8xf32>
    %cst_45 = arith.constant dense<0.000000e+00> : vector<16x16xf32>
    %74 = tpu.matmul %56, %56, %cst_45 {dimension_numbers = #tpu.dot_dimension_numbers<[1], [1], [0], [0], [0, 0, 1, 0], [], []>} : vector<16x8xf32>, vector<16x8xf32>, vector<16x16xf32> -> vector<16x16xf32>
    %75 = arith.subf %69, %74 : vector<16x16xf32>
    %76 = arith.mulf %75, %75 : vector<16x16xf32>
    %77 = vector.shape_cast %76 : vector<16x16xf32> to vector<1x16x16xf32>
    %cst_46 = arith.constant dense<0.000000e+00> : vector<1xf32>
    %78 = vector.multi_reduction <add>, %77, %cst_46 [1, 2] : vector<1x16x16xf32> to vector<1xf32>
    %79 = vector.shape_cast %78 : vector<1xf32> to vector<1x1x1xf32>
    %80 = vector.extract %79[0, 0, 0] : f32 from vector<1x1x1xf32>
    %cst_47 = arith.constant 0.000000e+00 : f32
    %81 = arith.addf %cst_47, %80 : f32
    %c0_48 = arith.constant 0 : index
    %c0_49 = arith.constant 0 : index
    %82 = vector.load %arg14[%c0_48, %c0_49] : memref<1x32xf32, #tpu.memory_space<vmem>>, vector<1x32xf32>
    %83 = vector.broadcast %82 : vector<1x32xf32> to vector<8x32xf32>
    %84 = arith.mulf %71, %83 : vector<8x32xf32>
    %c0_50 = arith.constant 0 : index
    %c0_51 = arith.constant 0 : index
    %85 = vector.load %arg15[%c0_50, %c0_51] : memref<1x32xf32, #tpu.memory_space<vmem>>, vector<1x32xf32>
    %86 = vector.broadcast %85 : vector<1x32xf32> to vector<8x32xf32>
    %87 = arith.addf %84, %86 : vector<8x32xf32>
    %cst_52 = arith.constant 0.000000e+00 : f32
    %88 = vector.broadcast %cst_52 : f32 to vector<8x32xf32>
    %89 = arith.maximumf %87, %88 : vector<8x32xf32>
    %c0_53 = arith.constant 0 : index
    %c0_54 = arith.constant 0 : index
    %c0_55 = arith.constant 0 : index
    %90 = vector.load %arg16[%c0_53, %c0_54, %c0_55] : memref<1x8x32xf32, #tpu.memory_space<vmem>>, vector<1x8x32xf32>
    %91 = vector.shape_cast %90 : vector<1x8x32xf32> to vector<8x32xf32>
    %92 = vector.shape_cast %89 : vector<8x32xf32> to vector<1x8x32xf32>
    tpu.vector_store %arg16[%c0_53, %c0_54, %c0_55], %92 {strides = array<i32>} : memref<1x8x32xf32, #tpu.memory_space<vmem>>, vector<1x8x32xf32>,
    %c0_56 = arith.constant 0 : index
    %c0_57 = arith.constant 0 : index
    %c0_58 = arith.constant 0 : index
    %93 = vector.load %arg17[%c0_56, %c0_57, %c0_58] : memref<1x8x8xf32, #tpu.memory_space<vmem>>, vector<1x8x8xf32>
    %94 = vector.shape_cast %93 : vector<1x8x8xf32> to vector<8x8xf32>
    %95 = vector.shape_cast %73 : vector<8x8xf32> to vector<1x8x8xf32>
    tpu.vector_store %arg17[%c0_56, %c0_57, %c0_58], %95 {strides = array<i32>} : memref<1x8x8xf32, #tpu.memory_space<vmem>>, vector<1x8x8xf32>,
    %96 = vector.broadcast %81 : f32 to vector<1x1x128xf32>
    %c0_59 = arith.constant 0 : index
    %c0_60 = arith.constant 0 : index
    %c0_61 = arith.constant 0 : index
    %97 = vector.load %arg19[%c0_59, %c0_60, %c0_61] : memref<1x1x128xf32, #tpu.memory_space<vmem>>, vector<1x1x128xf32>
    tpu.vector_store %arg19[%c0_59, %c0_60, %c0_61], %96 {strides = array<i32>} : memref<1x1x128xf32, #tpu.memory_space<vmem>>, vector<1x1x128xf32>,
    %98 = vector.broadcast %68 : f32 to vector<1x1x128xf32>
    %c0_62 = arith.constant 0 : index
    %c0_63 = arith.constant 0 : index
    %c0_64 = arith.constant 0 : index
    %99 = vector.load %arg20[%c0_62, %c0_63, %c0_64] : memref<1x1x128xf32, #tpu.memory_space<vmem>>, vector<1x1x128xf32>
    tpu.vector_store %arg20[%c0_62, %c0_63, %c0_64], %98 {strides = array<i32>} : memref<1x1x128xf32, #tpu.memory_space<vmem>>, vector<1x1x128xf32>,
    return
  }
  func.func @transform_0(%arg0: i32) -> (i32, i32, i32) {
    %c0_i32 = arith.constant 0 : i32
    %c0_i32_0 = arith.constant 0 : i32
    %c0_i32_1 = arith.constant 0 : i32
    return %arg0, %c0_i32, %c0_i32_0 : i32, i32, i32
  }
  func.func @transform_1(%arg0: i32) -> (i32, i32, i32) {
    %c0_i32 = arith.constant 0 : i32
    %c0_i32_0 = arith.constant 0 : i32
    %c0_i32_1 = arith.constant 0 : i32
    return %arg0, %c0_i32, %c0_i32_0 : i32, i32, i32
  }
  func.func @transform_2(%arg0: i32) -> (i32, i32, i32) {
    %c0_i32 = arith.constant 0 : i32
    %c0_i32_0 = arith.constant 0 : i32
    %c0_i32_1 = arith.constant 0 : i32
    return %arg0, %c0_i32, %c0_i32_0 : i32, i32, i32
  }
  func.func @transform_3(%arg0: i32) -> (i32, i32) {
    %c0_i32 = arith.constant 0 : i32
    %c0_i32_0 = arith.constant 0 : i32
    %c0_i32_1 = arith.constant 0 : i32
    return %c0_i32, %c0_i32_0 : i32, i32
  }
  func.func @transform_4(%arg0: i32) -> (i32, i32) {
    %c0_i32 = arith.constant 0 : i32
    %c0_i32_0 = arith.constant 0 : i32
    %c0_i32_1 = arith.constant 0 : i32
    return %c0_i32, %c0_i32_0 : i32, i32
  }
  func.func @transform_5(%arg0: i32) -> (i32, i32) {
    %c0_i32 = arith.constant 0 : i32
    %c0_i32_0 = arith.constant 0 : i32
    %c0_i32_1 = arith.constant 0 : i32
    return %c0_i32, %c0_i32_0 : i32, i32
  }
  func.func @transform_6(%arg0: i32) -> (i32, i32) {
    %c0_i32 = arith.constant 0 : i32
    %c0_i32_0 = arith.constant 0 : i32
    %c0_i32_1 = arith.constant 0 : i32
    return %c0_i32, %c0_i32_0 : i32, i32
  }
  func.func @transform_7(%arg0: i32) -> (i32, i32) {
    %c0_i32 = arith.constant 0 : i32
    %c0_i32_0 = arith.constant 0 : i32
    %c0_i32_1 = arith.constant 0 : i32
    return %c0_i32, %c0_i32_0 : i32, i32
  }
  func.func @transform_8(%arg0: i32) -> (i32, i32) {
    %c0_i32 = arith.constant 0 : i32
    %c0_i32_0 = arith.constant 0 : i32
    %c0_i32_1 = arith.constant 0 : i32
    return %c0_i32, %c0_i32_0 : i32, i32
  }
  func.func @transform_9(%arg0: i32) -> (i32, i32) {
    %c0_i32 = arith.constant 0 : i32
    %c0_i32_0 = arith.constant 0 : i32
    %c0_i32_1 = arith.constant 0 : i32
    return %c0_i32, %c0_i32_0 : i32, i32
  }
  func.func @transform_10(%arg0: i32) -> (i32, i32) {
    %c0_i32 = arith.constant 0 : i32
    %c0_i32_0 = arith.constant 0 : i32
    %c0_i32_1 = arith.constant 0 : i32
    return %c0_i32, %c0_i32_0 : i32, i32
  }
  func.func @transform_11(%arg0: i32) -> (i32, i32) {
    %c0_i32 = arith.constant 0 : i32
    %c0_i32_0 = arith.constant 0 : i32
    %c0_i32_1 = arith.constant 0 : i32
    return %c0_i32, %c0_i32_0 : i32, i32
  }
  func.func @transform_12(%arg0: i32) -> (i32, i32) {
    %c0_i32 = arith.constant 0 : i32
    %c0_i32_0 = arith.constant 0 : i32
    %c0_i32_1 = arith.constant 0 : i32
    return %c0_i32, %c0_i32_0 : i32, i32
  }
  func.func @transform_13(%arg0: i32) -> (i32, i32) {
    %c0_i32 = arith.constant 0 : i32
    %c0_i32_0 = arith.constant 0 : i32
    %c0_i32_1 = arith.constant 0 : i32
    return %c0_i32, %c0_i32_0 : i32, i32
  }
  func.func @transform_14(%arg0: i32) -> (i32, i32) {
    %c0_i32 = arith.constant 0 : i32
    %c0_i32_0 = arith.constant 0 : i32
    %c0_i32_1 = arith.constant 0 : i32
    return %c0_i32, %c0_i32_0 : i32, i32
  }
  func.func @transform_15(%arg0: i32) -> (i32, i32, i32) {
    %c0_i32 = arith.constant 0 : i32
    %c0_i32_0 = arith.constant 0 : i32
    %c0_i32_1 = arith.constant 0 : i32
    return %arg0, %c0_i32, %c0_i32_0 : i32, i32, i32
  }
  func.func @transform_16(%arg0: i32) -> (i32, i32, i32) {
    %c0_i32 = arith.constant 0 : i32
    %c0_i32_0 = arith.constant 0 : i32
    %c0_i32_1 = arith.constant 0 : i32
    return %arg0, %c0_i32, %c0_i32_0 : i32, i32, i32
  }
  func.func @transform_17(%arg0: i32) -> (i32, i32, i32) {
    %c0_i32 = arith.constant 0 : i32
    %c0_i32_0 = arith.constant 0 : i32
    %c0_i32_1 = arith.constant 0 : i32
    return %arg0, %c0_i32, %c0_i32_0 : i32, i32, i32
  }
  func.func @transform_18(%arg0: i32) -> (i32, i32, i32) {
    %c0_i32 = arith.constant 0 : i32
    %c0_i32_0 = arith.constant 0 : i32
    %c0_i32_1 = arith.constant 0 : i32
    return %arg0, %c0_i32, %c0_i32_0 : i32, i32, i32
  }
  func.func @transform_19(%arg0: i32) -> (i32, i32, i32) {
    %c0_i32 = arith.constant 0 : i32
    %c0_i32_0 = arith.constant 0 : i32
    %c0_i32_1 = arith.constant 0 : i32
    return %arg0, %c0_i32, %c0_i32_0 : i32, i32, i32
  }
}

</mosaic_0001>

<bundles_post_ra>
// kernel: tpu_custom_call.1
= control target key start
LH: loop header
LB: loop body
LE: loop exit
PB: predicated region body
PF: predicated region fallthrough
CT: control target
= control target key end

     0   :  { %s2171_s0 = inlined_call_operand.vmem [shape: f32[2,16,32], index: 0, kind: input, shape index: {}]   ;;  %s2172_s1 = inlined_call_operand.vmem [shape: f32[2,16,16], index: 1, kind: input, shape index: {}]   ;;  %s2173_s2 = inlined_call_operand.vmem [shape: f32[2,16,1], index: 2, kind: input, shape index: {}]   ;;  %s2174_s3 = inlined_call_operand.vmem [shape: f32[32,8], index: 3, kind: input, shape index: {}]   ;;  %s2175_s4 = inlined_call_operand.vmem [shape: f32[32,8], index: 4, kind: input, shape index: {}]   ;;  %s2176_s5 = inlined_call_operand.vmem [shape: f32[1,8], index: 5, kind: input, shape index: {}]   ;;  %s2177_s6 = inlined_call_operand.vmem [shape: f32[32,32], index: 6, kind: input, shape index: {}]   ;;  %s2178_s7 = inlined_call_operand.hbm [shape: f32[32,32], index: 7, kind: input, shape index: {}]   ;;  %s2179_s8 = inlined_call_operand.vmem [shape: f32[1,32], index: 8, kind: input, shape index: {}]   ;;  %s2180_s9 = inlined_call_operand.vmem [shape: f32[1,8], index: 9, kind: input, shape index: {}]   ;;  %s2181_s10 = inlined_call_operand.vmem [shape: f32[1,8], index: 10, kind: input, shape index: {}]   ;;  %s2182_s11 = inlined_call_operand.vmem [shape: f32[1,32], index: 11, kind: input, shape index: {}]   ;;  %s2183_s12 = inlined_call_operand.vmem [shape: f32[1,32], index: 12, kind: input, shape index: {}]   ;;  %s2184_s13 = inlined_call_operand.vmem [shape: f32[1,32], index: 13, kind: input, shape index: {}]   ;;  %s2185_s14 = inlined_call_operand.vmem [shape: f32[1,32], index: 14, kind: input, shape index: {}]   ;;  %s2186_s15 = inlined_call_operand.hbm [shape: f32[2,8,32], index: 15, kind: output, shape index: {0}]   ;;  %s2187_s16 = inlined_call_operand.hbm [shape: f32[2,8,8], index: 16, kind: output, shape index: {1}]   ;;  %s2188_s17 = inlined_call_operand.vmem [shape: f32[2,16,8], index: 17, kind: output, shape index: {2}]   ;;  %s2189_s18 = inlined_call_operand.hbm [shape: f32[2,1,128], index: 18, kind: output, shape index: {3}]   ;;  %s2190_s19 = inlined_call_operand.hbm [shape: f32[2,1,128], index: 19, kind: output, shape index: {4}]  }
   0x1   :  { %2200 = sst [smem:[#allocation19_spill]] %s2171_s0 }
   0x2   :  { %2201 = sst [smem:[#allocation20_spill]] %s2172_s1 }
   0x3   :  { %2202 = sst [smem:[#allocation21_spill]] %s2173_s2 }
   0x4   :  { %2203 = sst [smem:[#allocation22_spill]] %s2174_s3 }
   0x5   :  { %2204 = sst [smem:[#allocation23_spill]] %s2175_s4 }
   0x6   :  { %2205 = sst [smem:[#allocation24_spill]] %s2176_s5 }
   0x7   :  { %2206 = sst [smem:[#allocation25_spill]] %s2177_s6 }
   0x8   :  { %2207 = sst [smem:[#allocation26_spill]] %s2178_s7 }
   0x9   :  { %2208 = sst [smem:[#allocation27_spill]] %s2179_s8 }
   0xa   :  { %2209 = sst [smem:[#allocation28_spill]] %s2180_s9 }
   0xb   :  { %2210 = sst [smem:[#allocation29_spill]] %s2189_s18 }
   0xc   :  { %25 = vsyncpa [#allocation3], 0 }
   0xd   :  { %26 = vsyncpa [#allocation4], 0 }
   0xe   :  { %28 = vsyncpa [#allocation4 + $0x1], 0 }
   0xf   :  { %29 = vsyncpa [#allocation7], 0 }
  0x10   :  { %31 = vsyncpa [#allocation7 + $0x1], 0 }
  0x11   :  { %32 = vsyncpa [#allocation10], 0 }
  0x12   :  { %34 = vsyncpa [#allocation10 + $0x1], 0  ;;  %s1865_s0 = smov 0   ;;  %s1867_s30 = smov 0  }
  0x13   :  { %s1869_s20 = smov 0   ;;  %s1871_s21 = smov 0  }
  0x14 LB: > { %2211 = sst [smem:[#allocation15_spill]] %s1755_s20  ;;  %s1886_s1 = sadd.s32 4294967295, %s1759_s21   ;;  %s1759_s21 = sphi %s1871_s21, %s2233_s21   ;;  %s1755_s20 = sphi %s1869_s20, %s2235_s20   ;;  %s1751_s30 = sphi %s1867_s30, %s2237_s30   ;;  %s1747_s0 = sphi %s1865_s0, %s2236_s0  }
  0x15   : > { %s2192_s22 = sadd.s32 4294967294, %s1759_s21   ;;  %s1890_s2 = sadd.s32 1, %s1759_s21  }
  0x16   : > { %2212 = sst [smem:[#allocation16_spill]] %s1890_s2  ;;  %s377_s23 = sadd.s32 1, %s1755_s20 }
  0x17   : > { %s374_s24 = ssub.s32 %s1759_s21, %s1890_s2  ;;  %p387_p0 = scmp.ne.s32.totalorder %s1755_s20, %s1751_s30 }
  0x18   : > { %p375_p1 = scmp.eq.s32.totalorder %s374_s24, 0  ;;  %p388_p2 = scmp.eq.s32.totalorder %s1886_s1, 1 }
  0x19   : > { %p393_p3 = scmp.ne.s32.totalorder %s1751_s30, %s1747_s0  ;;  %p394_p4 = scmp.eq.s32.totalorder %s2192_s22, 1 }
  0x1a   : > { %s1903_s25 = scalar_select %p375_p1, %s1755_s20, %s377_s23  }
  0x1b   : > { %p1905_p5 = por %p388_p2, %p387_p0  ;;  %p1909_p6 = por %p394_p4, %p393_p3 }
  0x1c   : > { %2213 = sst [smem:[#allocation17_spill]] %s1903_s25  ;;  %p1431_p7 = scmp.ge.s32.totalorder %s1759_s21, 1 }
  0x1d   : > { %s2215_s26 = scalar_select %p1909_p6, 1, 0 }
  0x1e   : > { %p505_p8 = scmp.lt.s32.totalorder %s1759_s21, 3  ;;  %p1510_p9 = scmp.eq.s32.totalorder %s1886_s1, 0 }
  0x1f   : > { %2216 = sst [smem:[#allocation18_spill]] %s2215_s26  ;;  %s1761_s23 = smov [#allocation2]  }
  0x20   : > { %p506_p10 = pnand %p1431_p7, %p505_p8  ;;  %s2217_s7 = sld [smem:[#allocation26_spill]] }
  0x21   : > { %s530_s24 = sshll.u32 %s1761_s23, 4  ;;  %s1762_s22 = smov 128   ;;  %s531_s24 = int_to_ptr.vmem [resolvable:$true] %s530_s24 }
  0x22   : > { %p1493_p11 = pneg %p506_p10  ;;  %s1763_s25 = smov 8  }
  0x23   : > { %591 = sbr.rel (%p506_p10) target bundleno = 1085 (0x43d), region = 80 }
  0x24   : > { %p1494_p12 = pnand %p1510_p9, %p1493_p11 }
  0x26   : > { %s528_s29 = sshll.u32 %s2217_s7, 4  ;;  %s529_s29 = int_to_ptr.hbm [resolvable:$true] %s528_s29 }
  0x27   : > { %1496 = dma.hbm_to_vmem [thread:$0]  (!%p1494_p12), %s529_s29, 512, %s531_s24, [#allocation3], %s1762_s22, %s1762_s22, %s1763_s25  }
  0x28   : > { %1730 = dma.done.wait (%p1510_p9), [#allocation3], 512  }
  0x29   : > { %1732 = vsyncadd (%p1510_p9), [#allocation3], 4294966784  ;;  %p676_p13 = scmp.lt.s32.totalorder %s1886_s1, 1  ;;  %s2218_s20 = sld [smem:[#allocation19_spill]]  ;;  %vm702_vm0 = vcmask 130048   ;;  %v824_v5 = vld [vmem:[#allocation2 + $0x18] sm:$0xff] }
  0x2a   : > { %s2219_s29 = sld [smem:[#allocation20_spill]]  ;;  %v823_v6 = vld [vmem:[#allocation2 + $0x10] sm:$0xff]  ;;  %837 = vmatpush.msra.mxu3 %v824_v5  ;;  %v822_v9 = vld [vmem:[#allocation2 + $0x8] sm:$0xff]  ;;  %v821_v12 = vld [vmem:[#allocation2] sm:$0xff]  ;;  %vm740_vm1 = vcmask 261120   ;;  %v1764_v21 = vmov 0  }
  0x2b   : > { %s677_s27 = scalar_select %p676_p13, %s1886_s1, 1  ;;  %1550 = vset.pattern.permute.xlu0 %v1764_v21  ;;  %v1555_v43 = vld [vmem:[%s2182_s11] ss:$0 sm:$0xff]  ;;  %vm909_vm2 = vcmask 64512  }
  0x2c   : > { %s2220_s4 = sld [smem:[#allocation23_spill]]  ;;  %838 = vmatpush.msra.mxu3 %v823_v6  ;;  %v1554_v46 = vld [vmem:[%s2181_s10] ss:$0 sm:$0xff] }
  0x2d   : > { %s1927_s28 = sshll.u32 %s677_s27, 4  ;;  %s2221_s6 = sld [smem:[#allocation25_spill]]  ;;  %v1556_v50 = vld [vmem:[%s2183_s12] ss:$0 sm:$0xff] }
  0x2e   : > { %839 = vmatpush.msra.mxu3 %v822_v9  ;;  %s2224_s25 = sld [smem:[#allocation21_spill]] }
  0x2f   : > { %s680_s2 = scalar_lea.vmem %s2218_s20, %s1927_s28  ;;  %s2222_s20 = sld [smem:[#allocation22_spill]] }
  0x30   : > { %s1937_s24 = scalar_lea.vmem %s2219_s29, %s1927_s28  ;;  %v1939_v0 = vld [vmem:[%s680_s2 + $0x8] sm:$0xff]  ;;  %v1941_v1 = vld [vmem:[%s680_s2] sm:$0xff]  ;;  %840 = vmatpush.msra.mxu3 %v821_v12  ;;  %s2225_s8 = sld [smem:[#allocation27_spill]] }
  0x31   : > { %723 = vmatpush.msra.mxu0 %v1939_v0  ;;  %v1945_v2 = vld [vmem:[%s1937_s24] sm:$0xff]  ;;  %v1975_v15 = vld [vmem:[%s1937_s24 + $0x8] sm:$0xff]  ;;  %1452 = vmatmul.msk.f32.vlgmr.msra.gmra.mxu3 %vm740_vm1, %v1941_v1  ;;  %s2226_s5 = sld [smem:[#allocation24_spill]]  ;;  %s695_s2 = scalar_lea.vmem %s2188_s17, %s1927_s28 }
  0x32   : > { %v739_v3 = vld [vmem:[%s2220_s4 + $0x18] sm:$0xff]  ;;  %v738_v4 = vld [vmem:[%s2220_s4 + $0x10] sm:$0xff]  ;;  %v737_v7 = vld [vmem:[%s2220_s4 + $0x8] sm:$0xff]  ;;  %s2227_s9 = sld [smem:[#allocation28_spill]] }
  0x33   : > { %1473 = vmatpush.msra.mxu2 %v739_v3  ;;  %759 = vmatpush.msra.mxu1 %v739_v3  ;;  %v736_v8 = vld [vmem:[%s2220_s4] sm:$0xff]  ;;  %v820_v10 = vld [vmem:[%s2221_s6 + $0x18] sm:$0xff]  ;;  %v819_v13 = vld [vmem:[%s2221_s6 + $0x10] sm:$0xff] }
  0x34   : > { %724 = vmatpush.msra.mxu0 %v1941_v1  ;;  %v818_v14 = vld [vmem:[%s2221_s6 + $0x8] sm:$0xff]  ;;  %v817_v19 = vld [vmem:[%s2221_s6] sm:$0xff]  ;;  %s690_s29 = scalar_lea.vmem %s2224_s25, %s1927_s28  ;;  %s2060_s28 = sand.u32 1, %s1751_s30  }
  0x35   : > { %1446 = vmatmul.msk.f32.vlgmr.msra.gmra.mxu0 %vm702_vm0, %v1945_v2  ;;  %1474 = vmatpush.msra.mxu2 %v738_v4  ;;  %s2223_s18 = smov %s2222_s20  ;;  %v735_v11 = vld [vmem:[%s2222_s20 + $0x18] sm:$0xff]  ;;  %v700_v20 = vld [vmem:[%s690_s29] sm:$0xff]  ;;  %v701_v22 = vld [vmem:[%s690_s29 + $0x8] sm:$0xff]  ;;  %s2199_s26 = scalar_lea.vmem [#allocation9], %s2060_s28 }
  0x36   : > { %860 = vmatpush.msrb.mxu0 %v820_v10  ;;  %760 = vmatpush.msra.mxu1 %v738_v4  ;;  %v734_v16 = vld [vmem:[%s2223_s18 + $0x10] sm:$0xff]  ;;  %v733_v17 = vld [vmem:[%s2223_s18 + $0x8] sm:$0xff]  ;;  %v732_v18 = vld [vmem:[%s2223_s18] sm:$0xff]  ;;  %s2198_s7 = sshll.u32 %s2060_s28, 3  ;;  %s1465_s20 = sshll.u32 %s1886_s1, 3 }
  0x37   : > { %1475 = vmatpush.msra.mxu2 %v737_v7  ;;  %807 = vperm.xlu0 %1550, %v700_v20   ;;  %v1551_v27 = vld [vmem:[%s2225_s8] ss:$0 sm:$0xff]  ;;  %s649_s24 = scalar_lea.vmem [#allocation5], %s2198_s7  ;;  %s1176_s22 = scalar_lea.hbm %s2186_s15, %s1465_s20 }
  0x38   : > { %861 = vmatpush.msrb.mxu0 %v819_v13  ;;  %761 = vmatpush.msra.mxu1 %v737_v7  ;;  %v1552_v34 = vld [vmem:[%s2226_s5] ss:$0 sm:$0xff]  ;;  %s1178_s25 = sshll.u32 %s649_s24, 4  ;;  %s1180_s29 = sshll.u32 %s1176_s22, 4  ;;  %s1179_s25 = int_to_ptr.vmem [resolvable:$true] %s1178_s25  ;;  %s1181_s29 = int_to_ptr.hbm [resolvable:$true] %s1180_s29 }
  0x39   : > { %1476 = vmatpush.msra.mxu2 %v736_v8  ;;  %1453 = vmatmul.msk.f32.gmra.mxu3 %vm740_vm1, %v1939_v0  ;;  %v1553_v42 = vld [vmem:[%s2227_s9] ss:$0 sm:$0xff]  ;;  %s1148_s27 = scalar_lea.sflag [#allocation4], %s2060_s28  ;;  %s1615_s7 = sshra.s32 %s1181_s29, 4  ;;  %s1616_s7 = int_to_ptr.hbm [resolvable:$true] %s1615_s7 }
  0x3a   : > { %1449 = vmatmul.msk.f32.vlgmr.msra.gmra.mxu2 %vm740_vm1, %v1939_v0  ;;  %862 = vmatpush.msrb.mxu0 %v818_v14  ;;  %s1621_s6 = scalar_lea.hbm %s2186_s15, 16  ;;  %p1622_p3 = scmp.lt.s32.totalorder %s1616_s7, %s2186_s15 }
  0x3b   : > { %788 = vmatpush.msrb.mxu2 %v735_v11  ;;  %762 = vmatpush.msra.mxu1 %v736_v8 }
  0x3c   : > { %1448 = vmatmul.msk.f32.vlgmr.msra.gmra.mxu1 %vm740_vm1, %v1941_v1  ;;  %863 = vmatpush.msrb.mxu0 %v817_v19 }
  0x3d   : > { %1447 = vmatmul.msk.f32.gmra.mxu0 %vm702_vm0, %v1975_v15  ;;  %789 = vmatpush.msrb.mxu2 %v734_v16 }
  0x3f   : > { %790 = vmatpush.msrb.mxu2 %v733_v17  ;;  %812 = vperm.xlu0 %1550, %v701_v22  }
  0x41   : > { %791 = vmatpush.msrb.mxu2 %v732_v18 }
  0x43   : > { %1055 = vmatpush.msra.mxu2 %v1975_v15 }
  0x45   : > { %1056 = vmatpush.msra.mxu2 %v1945_v2 }
  0xa9   : > { %v2012_v30 = vpop.permute.xlu0 %807 }
  0xb1   : > { %v2029_v47 = vpop.permute.xlu0 %812 }
  0xb2   : > { %v726_v23 = vpop.f32.mrf.mxu0 }
  0xb3   : > { %1450 = vmatmul.msk.f32.vlgmr.msrb.gmra.mxu2 %vm740_vm1, %v726_v23  ;;  %1454 = vmatmul.msk.f32.vlgmr.msrb.gmra.mxu0 %vm740_vm1, %v726_v23 }
  0xb4   : > { %v842_v26 = vpop.f32.mrf.mxu3 }
  0xb9   : > { %v764_v32 = vpop.f32.mrf.mxu1 }
  0xba   : > { %v729_v24 = vpop.f32.mrf.mxu0 }
  0xbb   : > { %1451 = vmatmul.msk.f32.gmra.mxu2 %vm740_vm1, %v729_v24  ;;  %1455 = vmatmul.msk.f32.gmra.mxu0 %vm740_vm1, %v729_v24 }
  0xbc   : > { %v845_v36 = vpop.f32.mrf.mxu3 }
  0xbd   : > { %v767_v25 = vpop.f32.mrf.mxu2 }
 0x130   : > { %v865_v28 = vpop.f32.mrf.mxu0 }
 0x131   : > { %v866_v29 = vadd.f32 %v865_v28, %v842_v26 }
 0x133   : > { %v875_v31 = vadd.f32 %v1551_v27, %v866_v29 }
 0x135   : > { %v877_v33 = vmul.f32 %v875_v31, %v2012_v30 }
 0x136   : > { %v793_v35 = vpop.f32.mrf.mxu2 }
 0x137   : > { %v794_v37 = vadd.f32 %v793_v35, %v764_v32  ;;  %v893_v39 = vadd.f32 %v877_v33, %v1941_v1 }
 0x138   : > { %v868_v38 = vpop.f32.mrf.mxu0 }
 0x139   : > { %v803_v40 = vadd.f32 %v1552_v34, %v794_v37  ;;  %v869_v41 = vadd.f32 %v868_v38, %v845_v36  ;;  %v899_v51 = vmul.f32 %v1555_v43, %v893_v39 }
 0x13b   : > { %v815_v44 = vmul.f32 %v2012_v30, %v803_v40  ;;  %v876_v45 = vadd.f32 %v1551_v27, %v869_v41  ;;  %v905_v59 = vadd.f32 %v1556_v50, %v899_v51 }
 0x13d   : > { %v878_v48 = vmul.f32 %v876_v45, %v2029_v47  ;;  %v883_v49 = vmul.f32 %v1553_v42, %v815_v44  ;;  %v907_v1 = vmax.f32 %v905_v59, 0.0 }
 0x13e   : > { %v796_v52 = vpop.f32.mrf.mxu2 }
 0x13f   : > { %v894_v53 = vadd.f32 %v878_v48, %v1939_v0  ;;  %v797_v54 = vadd.f32 %v796_v52, %v767_v25  ;;  %v889_v55 = vadd.f32 %v1554_v46, %v883_v49  ;;  %v962_v0 = vmul.f32 %v907_v1, %v2012_v30 }
 0x141   : > { %v804_v56 = vadd.f32 %v1552_v34, %v797_v54  ;;  %v891_v57 = vmax.f32 %v889_v55, 0.0  ;;  %v900_v58 = vmul.f32 %v1555_v43, %v894_v53 }
 0x143   : > { %v816_v60 = vmul.f32 %v2029_v47, %v804_v56  ;;  %v910_v61 = vsel %vm909_vm2, %v891_v57, -inf  ;;  %v906_v62 = vadd.f32 %v1556_v50, %v900_v58 }
 0x144   : > { %911 = vmax.xlane.f32.xlu1 %v910_v61 }
 0x145   : > { %v908_v63 = vmax.f32 %v906_v62, 0.0  ;;  %v884_v3 = vmul.f32 %v1553_v42, %v816_v60 }
 0x147   : > { %v963_v4 = vmul.f32 %v908_v63, %v2029_v47  ;;  %v890_v5 = vadd.f32 %v1554_v46, %v884_v3 }
 0x149   : > { %1035 = vmatpush.msrb.mxu1 %v963_v4  ;;  %v892_v6 = vmax.f32 %v890_v5, 0.0  ;;  %v1557_v5 = vld [vmem:[%s2184_s13] ss:$0 sm:$0xff] }
 0x14b   : > { %1036 = vmatpush.msrb.mxu1 %v962_v0  ;;  %v913_v7 = vsel %vm909_vm2, %v892_v6, -inf  ;;  %v1558_v0 = vld [vmem:[%s2185_s14] ss:$0 sm:$0xff] }
 0x14c   : > { %914 = vmax.xlane.f32.xlu1 %v913_v7 }
 0x1b7   : > { %v912_v8 = vpop.xlane.xlu1 %911 }
 0x1b8   : > { %v916_v9 = vsub.f32 %v891_v57, %v912_v8 }
 0x1ba   : > { %v918_v10 = vmul.f32 1.442695, %v916_v9 }
 0x1bc   : > { %1559 = vpow2.f32 %v918_v10 }
 0x1bf   : > { %v915_v11 = vpop.xlane.xlu1 %914 }
 0x1c0   : > { %v917_v12 = vsub.f32 %v892_v6, %v915_v11 }
 0x1c2   : > { %v1560_v13 = vpop.eup %1559  ;;  %v920_v14 = vmul.f32 1.442695, %v917_v12 }
 0x1c3   : > { %v922_v16 = vsel %vm909_vm2, %v1560_v13, 0.0 }
 0x1c4   : > { %1561 = vpow2.f32 %v920_v14  ;;  %923 = vadd.xlane.f32.xlu2 %v922_v16 }
 0x1ca   : > { %v1562_v17 = vpop.eup %1561 }
 0x1cb   : > { %v925_v18 = vsel %vm909_vm2, %v1562_v17, 0.0 }
 0x1cc   : > { %926 = vadd.xlane.f32.xlu2 %v925_v18 }
 0x237   : > { %v924_v19 = vpop.xlane.xlu2 %923 }
 0x238   : > { %1563 = vrcp.f32 %v924_v19  ;;  %v939_v24 = vand.u32 2147483648, %v924_v19  ;;  %v937_v26 = vand.u32 2147483647, %v924_v19  ;;  %vm933_vm4 = vweird.f32 %v924_v19 }
 0x23a   : > { %v940_v29 = vor.u32 1.1754944e-38, %v939_v24  ;;  %vm938_vm6 = vcmp.eq.f32.partialorder %v937_v26, 8.507059e+37 }
 0x23e   : > { %v1564_v20 = vpop.eup %1563 }
 0x23f   : > { %v929_v21 = vmul.f32 %v1564_v20, %v924_v19  ;;  %v927_v22 = vpop.xlane.xlu2 %926  ;;  %vm934_vm3 = vweird.f32 %v1564_v20 }
 0x240   : > { %1565 = vrcp.f32 %v927_v22  ;;  %vm935_vm5 = vmor %vm933_vm4, %vm934_vm3  ;;  %v954_v36 = vand.u32 2147483648, %v927_v22  ;;  %v952_v39 = vand.u32 2147483647, %v927_v22  ;;  %vm948_vm8 = vweird.f32 %v927_v22 }
 0x241   : > { %v930_v23 = vsub.f32 1.0, %v929_v21 }
 0x242   : > { %v955_v42 = vor.u32 1.1754944e-38, %v954_v36  ;;  %vm953_vm10 = vcmp.eq.f32.partialorder %v952_v39, 8.507059e+37 }
 0x243   : > { %v931_v25 = vmul.f32 %v1564_v20, %v930_v23 }
 0x245   : > { %v932_v27 = vadd.f32 %v1564_v20, %v931_v25 }
 0x246   : > { %v1566_v28 = vpop.eup %1565 }
 0x247   : > { %v936_v31 = vsel %vm935_vm5, %v1564_v20, %v932_v27  ;;  %v944_v32 = vmul.f32 %v1566_v28, %v927_v22  ;;  %vm949_vm7 = vweird.f32 %v1566_v28 }
 0x248   : > { %v941_v33 = vsel %vm938_vm6, %v940_v29, %v936_v31  ;;  %vm950_vm9 = vmor %vm948_vm8, %vm949_vm7 }
 0x249   : > { %v942_v34 = vmul.f32 %v1560_v13, %v941_v33  ;;  %v945_v35 = vsub.f32 1.0, %v944_v32 }
 0x24b   : > { %958 = vst.msk [vmem:[%s695_s2] sm:$0xff] %vm909_vm2, %v942_v34  ;;  %v960_v37 = vmul.f32 %v942_v34, %v2012_v30  ;;  %v946_v38 = vmul.f32 %v1566_v28, %v945_v35 }
 0x24d   : > { %v947_v40 = vadd.f32 %v1566_v28, %v946_v38  ;;  %986 = vxpose.xlu0.b32.start [1/2] (short) (narrow) %v960_v37, 8  ;;  %v966_v41 = vadd.f32 1e-15, %v960_v37  ;;  %v964_v50 = vsub.f32 0.0, %v960_v37 }
 0x24f   : > { %v951_v43 = vsel %vm950_vm9, %v1566_v28, %v947_v40  ;;  %1567 = vlog2.f32 %v966_v41 }
 0x250   : > { %v956_v44 = vsel %vm953_vm10, %v955_v42, %v951_v43 }
 0x251   : > { %v957_v45 = vmul.f32 %v1562_v17, %v956_v44 }
 0x253   : > { %959 = vst.msk [vmem:[%s695_s2 + $0x8] sm:$0xff] %vm909_vm2, %v957_v45  ;;  %v961_v46 = vmul.f32 %v957_v45, %v2029_v47 }
 0x255   : > { %987 = vxpose.xlu0.b32.end [2/2] (short) (narrow) %v961_v46, 8  ;;  %1078 = vmatpush.msrb.mxu3 %v961_v46  ;;  %v967_v30 = vadd.f32 1e-15, %v961_v46  ;;  %v1568_v48 = vpop.eup %1567  ;;  %v965_v52 = vsub.f32 0.0, %v961_v46 }
 0x256   : > { %1459 = vmatpush.xpose.msk.msra.mxu1 %vm909_vm2, %v961_v46  ;;  %v969_v49 = vmul.f32 0.6931472, %v1568_v48 }
 0x257   : > { %1079 = vmatpush.msrb.mxu3 %v960_v37  ;;  %1569 = vlog2.f32 %v967_v30 }
 0x258   : > { %v972_v54 = vmul.f32 %v969_v49, %v964_v50 }
 0x25a   : > { %1460 = vmatpush.xpose.msk.msra.mxu1 %vm909_vm2, %v960_v37  ;;  %v974_v56 = vsel %vm909_vm2, %v972_v54, 0.0 }
 0x25d   : > { %v1570_v51 = vpop.eup %1569 }
 0x25e   : > { %v971_v53 = vmul.f32 0.6931472, %v1570_v51 }
 0x260   : > { %v973_v55 = vmul.f32 %v971_v53, %v965_v52 }
 0x262   : > { %v975_v47 = vsel %vm909_vm2, %v973_v55, 0.0 }
 0x263   : > { %v976_v57 = vadd.f32 %v975_v47, %v974_v56 }
 0x265   : > { %977 = vadd.xlane.f32.xlu1 %v976_v57 }
 0x2d8   : > { %v978_v58 = vpop.xlane.xlu1 %977 }
 0x2d9   : > { %v979_v59 = vrot.slane %v978_v58, 4 }
 0x2db   : > { %v980_v60 = vadd.f32 %v979_v59, %v978_v58 }
 0x2dd   : > { %v981_v61 = vrot.slane %v980_v60, 2 }
 0x2df   : > { %v982_v62 = vadd.f32 %v981_v61, %v980_v60 }
 0x2e1   : > { %v983_v63 = vrot.slane %v982_v62, 1 }
 0x2e3   : > { %v984_v1 = vadd.f32 %v983_v63, %v982_v62 }
 0x2e5   : > { %1477 = vpush %v984_v1 }
 0x2f1   : > { %v1002_v3 = vpop.trf.xlu0 }
 0x2f2   : > { %1456 = vmatmul.msk.f32.vlgmr.msrb.gmra.mxu1 %vm702_vm0, %v1002_v3  ;;  %1457 = vmatmul.msk.f32.vlgmr.msra.gmra.mxu2 %vm702_vm0, %v1002_v3 }
 0x2fa   : > { %1461 = vmatmul.msk.f32.vlgmr.msra.gmra.mxu1 %vm909_vm2, %v960_v37 }
 0x302   : > { %1462 = vmatmul.msk.f32.gmra.mxu1 %vm909_vm2, %v961_v46 }
 0x316   : > { %s1478_s23 = spop %1477 }
 0x317   : > { %v1145_v4 = vstv %s1478_s23 }
 0x318   : > { %1146 = vst [vmem:[%s2199_s26] sm:$0x1] %v1145_v4  ;;  %s1617_s26 = scalar_lea.hbm %s1616_s7, 8 }
 0x319   : > { %p1618_p0 = scmp.ne.s32.totalorder %s1616_s7, %s1617_s26  ;;  %p1623_p4 = scmp.lt.s32.totalorder %s1621_s6, %s1617_s26 }
 0x31b   : > { %p1619_p1 = pnand %p1618_p0, %p1905_p5  ;;  %p1624_p7 = por %p1623_p4, %p1622_p3 }
 0x31d   : > { %p1620_p2 = pneg %p1619_p1 }
 0x31f   : > { %p1625_p8 = pnand %p1624_p7, %p1620_p2 }
 0x36f   : > { %v1038_v6 = vpop.f32.mrf.mxu1 }
 0x370   : > { %v1134_v7 = vmul.f32 %v1557_v5, %v1038_v6 }
 0x372   : > { %v1139_v8 = vadd.f32 %v1558_v0, %v1134_v7 }
 0x374   : > { %v1140_v9 = vmax.f32 %v1139_v8, 0.0 }
 0x375   : > { %v1058_v10 = vpop.f32.mrf.mxu2 }
 0x376   : > { %1458 = vmatmul.msk.f32.vlgmr.msrb.gmra.mxu3 %vm702_vm0, %v1058_v10  ;;  %1141 = vst.msk [vmem:[%s649_s24] sm:$0xff] %vm740_vm1, %v1140_v9 }
 0x377   : > { %v1107_v11 = vpop.f32.mrf.mxu1 }
 0x378   : > { %v1113_v12 = vsub.f32 %v1945_v2, %v1107_v11 }
 0x37a   : > { %v1115_v14 = vmul.f32 %v1113_v12, %v1113_v12 }
 0x37c   : > { %v1117_v18 = vsel %vm702_vm0, %v1115_v14, 0.0 }
 0x37f   : > { %v1110_v13 = vpop.f32.mrf.mxu1 }
 0x380   : > { %v1114_v16 = vsub.f32 %v1975_v15, %v1110_v13 }
 0x382   : > { %v1116_v17 = vmul.f32 %v1114_v16, %v1114_v16 }
 0x384   : > { %v1118_v19 = vsel %vm702_vm0, %v1116_v17, 0.0 }
 0x385   : > { %v1119_v20 = vadd.f32 %v1118_v19, %v1117_v18 }
 0x387   : > { %1120 = vadd.xlane.f32.xlu2 %v1119_v20 }
 0x388   : > { %1628 = shalt.err (!%p1625_p8)
}
 0x389   : > { %1485 = dma.vmem_to_hbm [thread:$0]  (%p1905_p5), %s1179_s25, 128, %s1181_s29, %s1148_s27  }
 0x38a   : > { %s1219_s4 = scalar_lea.hbm %s2190_s19, %s1886_s1  ;;  %s2228_s5 = scalar_lea.vmem [#allocation9], %s2060_s28 }
 0x38b   : > { %s1221_s23 = sshll.u32 %s2228_s5, 4  ;;  %s1223_s8 = sshll.u32 %s1219_s4, 4  ;;  %s1222_s23 = int_to_ptr.vmem [resolvable:$true] %s1221_s23  ;;  %s1224_s8 = int_to_ptr.hbm [resolvable:$true] %s1223_s8 }
 0x38c   : > { %s1167_s6 = scalar_lea.sflag [#allocation10], %s2060_s28  ;;  %s1643_s9 = sshra.s32 %s1224_s8, 4  ;;  %s1644_s9 = int_to_ptr.hbm [resolvable:$true] %s1643_s9 }
 0x38d   : > { %s1645_s26 = scalar_lea.hbm %s1644_s9, 1  ;;  %s1649_s25 = scalar_lea.hbm %s2190_s19, 2 }
 0x38e   : > { %p1646_p9 = scmp.ne.s32.totalorder %s1644_s9, %s1645_s26  ;;  %p1650_p12 = scmp.lt.s32.totalorder %s1644_s9, %s2190_s19 }
 0x38f   : > { %p1651_p13 = scmp.lt.s32.totalorder %s1649_s25, %s1645_s26 }
 0x390   : > { %p1647_p10 = pnand %p1646_p9, %p1905_p5 }
 0x391   : > { %p1652_p0 = por %p1651_p13, %p1650_p12 }
 0x392   : > { %p1648_p11 = pneg %p1647_p10 }
 0x394   : > { %p1653_p1 = pnand %p1652_p0, %p1648_p11 }
 0x396   : > { %1656 = shalt.err (!%p1653_p1)
}
 0x397   : > { %1488 = dma.vmem_to_hbm [thread:$0]  (%p1905_p5), %s1222_s23, 16, %s1224_s8, %s1167_s6  }
 0x398   : > { %s1190_s4 = scalar_lea.hbm %s2187_s16, %s1465_s20  ;;  %s1152_s5 = sand.u32 1, %s1886_s1  }
 0x399   : > { %s2229_s7 = sshll.u32 %s2060_s28, 3  ;;  %s1194_s26 = sshll.u32 %s1190_s4, 4  ;;  %s1195_s26 = int_to_ptr.hbm [resolvable:$true] %s1194_s26 }
 0x39a   : > { %s656_s22 = scalar_lea.vmem [#allocation6], %s2229_s7  ;;  %s2123_s25 = scalar_lea.sflag [#allocation7], %s1152_s5 }
 0x39b   : > { %s1192_s9 = sshll.u32 %s656_s22, 4  ;;  %s1671_s23 = sshra.s32 %s1195_s26, 4  ;;  %s1193_s9 = int_to_ptr.vmem [resolvable:$true] %s1192_s9  ;;  %s1672_s23 = int_to_ptr.hbm [resolvable:$true] %s1671_s23 }
 0x39c   : > { %s1673_s8 = scalar_lea.hbm %s1672_s23, 8  ;;  %s1677_s29 = scalar_lea.hbm %s2187_s16, 16 }
 0x39d   : > { %p1674_p2 = scmp.ne.s32.totalorder %s1672_s23, %s1673_s8  ;;  %p1678_p7 = scmp.lt.s32.totalorder %s1672_s23, %s2187_s16 }
 0x39e   : > { %p1679_p8 = scmp.lt.s32.totalorder %s1677_s29, %s1673_s8 }
 0x39f   : > { %p1675_p3 = pnand %p1674_p2, %p1905_p5 }
 0x3a0   : > { %p1680_p9 = por %p1679_p8, %p1678_p7 }
 0x3a1   : > { %p1676_p4 = pneg %p1675_p3 }
 0x3a3   : > { %p1681_p10 = pnand %p1680_p9, %p1676_p4 }
 0x3f9   : > { %v1081_v2 = vpop.f32.mrf.mxu3 }
 0x3fa   : > { %1142 = vst.msk [vmem:[%s656_s22] sm:$0xff] %vm909_vm2, %v1081_v2  ;;  %v1121_v15 = vpop.xlane.xlu2 %1120 }
 0x3fb   : > { %v1122_v21 = vrot.slane %v1121_v15, 4 }
 0x3fc   : > { %1684 = shalt.err (!%p1681_p10)
}
 0x3fd   : > { %1486 = dma.vmem_to_hbm [thread:$0]  (%p1905_p5), %s1193_s9, 128, %s1195_s26, %s2123_s25   ;;  %v1123_v22 = vadd.f32 %v1122_v21, %v1121_v15 }
 0x3fe   : > { %s2230_s5 = sld [smem:[#allocation29_spill]]  ;;  %s669_s22 = scalar_lea.vmem [#allocation8], %s2060_s28 }
 0x3ff   : > { %v1124_v23 = vrot.slane %v1123_v22, 2  ;;  %s1208_s23 = sshll.u32 %s669_s22, 4  ;;  %s1209_s23 = int_to_ptr.vmem [resolvable:$true] %s1208_s23 }
 0x401   : > { %v1125_v24 = vadd.f32 %v1124_v23, %v1123_v22 }
 0x403   : > { %v1126_v25 = vrot.slane %v1125_v24, 1 }
 0x404   : > { %s1206_s7 = scalar_lea.hbm %s2230_s5, %s1886_s1  ;;  %s1705_s27 = scalar_lea.hbm %s2230_s5, 2 }
 0x405   : > { %v1127_v26 = vadd.f32 %v1126_v25, %v1125_v24  ;;  %s1210_s8 = sshll.u32 %s1206_s7, 4  ;;  %s1211_s8 = int_to_ptr.hbm [resolvable:$true] %s1210_s8 }
 0x406   : > { %s1699_s9 = sshra.s32 %s1211_s8, 4  ;;  %s1700_s9 = int_to_ptr.hbm [resolvable:$true] %s1699_s9 }
 0x407   : > { %1479 = vpush %v1127_v26  ;;  %s1701_s26 = scalar_lea.hbm %s1700_s9, 1  ;;  %p1706_p0 = scmp.lt.s32.totalorder %s1700_s9, %s2230_s5 }
 0x408   : > { %p1702_p11 = scmp.ne.s32.totalorder %s1700_s9, %s1701_s26  ;;  %p1707_p1 = scmp.lt.s32.totalorder %s1705_s27, %s1701_s26 }
 0x40a   : > { %p1703_p12 = pnand %p1702_p11, %p1905_p5  ;;  %p1708_p2 = por %p1707_p1, %p1706_p0 }
 0x40c   : > { %p1704_p13 = pneg %p1703_p12 }
 0x40e   : > { %p1709_p3 = pnand %p1708_p2, %p1704_p13 }
 0x438   : > { %s1480_s20 = spop %1479 }
 0x439   : > { %v1143_v27 = vstv %s1480_s20 }
 0x43a   : > { %1144 = vst [vmem:[%s669_s22] sm:$0x1] %v1143_v27 }
 0x43b   : > { %1712 = shalt.err (!%p1709_p3)
}
 0x43c   : > { %1487 = dma.vmem_to_hbm [thread:$0]  (%p1905_p5), %s1209_s23, 16, %s1211_s8, %s2123_s25  }
 0x43d PF: > { %p1512_p4 = scmp.ge.s32.totalorder %s1759_s21, 2  ;;  %s1235_s2 = sand.u32 1, %s1747_s0  }
 0x43e   : > { %s1236_s4 = scalar_lea.sflag [#allocation4], %s1235_s2 }
 0x43f   : > { %p1498_p7 = pnand %p1512_p4, %p1909_p6 }
 0x441   : > { %p1499_p8 = pneg %p1498_p7 }
 0x443   : > { %1734 = dma.done.wait (%p1499_p8), %s1236_s4, 128  }
 0x444   : > { %1736 = vsyncadd (%p1499_p8), %s1236_s4, 4294967168  ;;  %s2232_s7 = sadd.s32 4294967294, %s1759_s21  }
 0x445   : > { %s1245_s22 = sand.u32 1, %s2232_s7  }
 0x446   : > { %s1246_s20 = scalar_lea.sflag [#allocation7], %s1245_s22 }
 0x447   : > { %1738 = dma.done.wait (%p1499_p8), %s1246_s20, 144  }
 0x448   : > { %1740 = vsyncadd (%p1499_p8), %s1246_s20, 4294967152  ;;  %s1273_s3 = scalar_lea.sflag [#allocation10], %s1235_s2 }
 0x449   : > { %1742 = dma.done.wait (%p1499_p8), %s1273_s3, 16  }
 0x44a   : > { %1744 = vsyncadd (%p1499_p8), %s1273_s3, 4294967280  ;;  %s2233_s21 = sld [smem:[#allocation16_spill]]  ;;  %s2236_s0 = smov %s1751_s30 }
 0x44b   : > { %s2234_s25 = sld [smem:[#allocation15_spill]] }
 0x44c   : > { %s2235_s20 = sld [smem:[#allocation17_spill]] }
 0x450   : > { %p37_p5 = scmp.ge.s32.totalorder %s2233_s21, 4  }
 0x451   : > { %s2237_s30 = smov %s2234_s25 }
 0x452   :  { %39 = sbr.rel (!%p37_p5) target bundleno = 20 (0x14), region = 187 }
 0x457   :  { %1278 = vsyncpa [#allocation3], 1 }
 0x458   :  { %1280 = vsyncpa [#allocation3 + $0x1], 1 }
 0x459   :  { %1281 = vsyncpa [#allocation4], 1 }
 0x45a   :  { %1283 = vsyncpa [#allocation4 + $0x1], 1 }
 0x45b   :  { %1284 = vsyncpa [#allocation7], 1 }
 0x45c   :  { %1286 = vsyncpa [#allocation7 + $0x1], 1 }
 0x45d   :  { %1287 = vsyncpa [#allocation10], 1 }
 0x45e   :  { %1289 = vsyncpa [#allocation10 + $0x1], 1 }

</bundles_post_ra>
